<compile_context>
chip_gen: v5e
topology: v5e:2x2
jax: 0.10.0
libtpu: 0.0.40
codegen_flags: <defaults>
</compile_context>

<pallas_src>
import math

import jax
import jax.numpy as jnp
from jax.experimental import pallas as pl
from jax.experimental.pallas import tpu as pltpu


def _round_up(n, m):
    return ((n + m - 1) // m) * m


def _cdiv(a, b):
    return (a + b - 1) // b


# Probe once whether this JAX build supports BlockSpec(pipeline_mode=...).
try:
    pl.BlockSpec((8, 128), lambda i: (0, 0), pipeline_mode=pl.Buffered(1))
    _HAS_PIPELINE_MODE = True
except Exception:  # pragma: no cover - older builds
    _HAS_PIPELINE_MODE = False


def _single_buffered_spec(shape, index_map):
    """BlockSpec for a grid-invariant block: one VMEM copy instead of two."""
    if _HAS_PIPELINE_MODE:
        return pl.BlockSpec(shape, index_map, pipeline_mode=pl.Buffered(1))
    return pl.BlockSpec(shape, index_map)


# ---------------------------------------------------------------------------
# Kernel bodies
# ---------------------------------------------------------------------------

def mlp_kernel_resident(x_ref, w1_ref, b1_ref, w2_ref, b2_ref, o_ref):
    """Weight-resident fast path (grid = (batch_tiles,), hidden not tiled).

    Computes directly into o_ref: no accumulator scratch, no zero/RMW/finalize
    passes over a (tile_b, out_p) f32 buffer (relieves the single vst slot on
    v5e and frees VMEM on v7x).
    """
    h = jnp.dot(x_ref[...], w1_ref[...], preferred_element_type=jnp.float32)
    h = jnp.maximum(h + b1_ref[...].astype(jnp.float32), 0.0)
    # TODO(synk): with bf16 activations on v6e/v7x, do bias+ReLU in bf16
    # (native bf16 VPU) to halve VALU work; keep f32 on v5e (no bf16 VALU).
    y = jnp.dot(h.astype(w2_ref.dtype), w2_ref[...],
                preferred_element_type=jnp.float32)
    o_ref[...] = (y + b2_ref[...].astype(jnp.float32)).astype(o_ref.dtype)


def mlp_kernel_hidden_tiled(x_ref, w1_ref, b1_ref, w2_ref, b2_ref, o_ref,
                            acc_ref):
    """General path: hidden is a reduction grid axis, f32 VMEM accumulator."""
    k = pl.program_id(1)

    @pl.when(k == 0)
    def _zero():
        acc_ref[...] = jnp.zeros_like(acc_ref)

    h = jnp.dot(x_ref[...], w1_ref[...], preferred_element_type=jnp.float32)
    h = jnp.maximum(h + b1_ref[...].astype(jnp.float32), 0.0)
    # ReLU is elementwise over hidden, so splitting hidden is exact.
    acc_ref[...] += jnp.dot(h.astype(w2_ref.dtype), w2_ref[...],
                            preferred_element_type=jnp.float32)

    @pl.when(k == pl.num_programs(1) - 1)
    def _store():
        o_ref[...] = (acc_ref[...] +
                      b2_ref[...].astype(jnp.float32)).astype(o_ref.dtype)


# ---------------------------------------------------------------------------
# Wrapper
# ---------------------------------------------------------------------------

def simple_feed_forward(x, w1, b1, w2, b2, *, tile_b=512, tile_h=512,
                        weight_resident=None):
    """Fused Linear->ReLU->Linear.

    x:  [B, in_dim]
    w1: [in_dim, hidden], b1: [1, hidden]
    w2: [hidden, out_dim], b2: [1, out_dim]
    Returns [B, out_dim] in x.dtype.

    tile_b / tile_h are *targets*; actual tiles are balanced so padding waste
    is bounded by the sublane/lane quantum.  weight_resident=None auto-selects
    the weight-resident (n_k == 1) mode from the VMEM budget; True/False force.
    """
    B, in_dim = x.shape
    hidden = w1.shape[1]
    out_dim = w2.shape[1]
    assert w1.shape == (in_dim, hidden)
    assert b1.shape == (1, hidden)
    assert w2.shape == (hidden, out_dim)
    assert b2.shape == (1, out_dim)

    LANE = 128                                      # lane quantum (last dim)
    SUB = 16 if x.dtype == jnp.bfloat16 else 8      # sublane quantum
    x_isz = x.dtype.itemsize
    w_isz = w1.dtype.itemsize

    # --- VMEM budget from the actual chip (64 MiB v7x, 128 MiB v5e/v6e). ---
    try:
        vmem_cap = int(pltpu.get_tpu_info().vmem_capacity_bytes)
    except Exception:  # conservative default if the query is unavailable
        vmem_cap = 64 * 1024 * 1024
    vmem_budget = int(vmem_cap * 0.85)   # headroom for compiler scratch

    # --- Padded feature dims (lane-dense output stores, (8,128)-legal). ---
    # TODO(synk): on v6e/v7x, padding in_p/out_p/tile_h to 256 multiples feeds
    # the 256-wide MXU at full occupancy when dims already exceed 128.
    in_p = _round_up(in_dim, LANE)
    out_p = _round_up(out_dim, LANE)
    hid128 = _round_up(hidden, LANE)

    # --- Balanced batch tiling (+ guarantee >=2 "parallel" steps for v7x). ---
    def balance_batch(target):
        nb = max(1, _cdiv(B, max(target, SUB)))
        if nb < 2 and B > SUB:
            nb = 2                       # let the 2 v7x TensorCores both work
        tb = _round_up(_cdiv(B, nb), SUB)
        return tb, nb

    # VMEM working set if weights stay resident (single-buffered when the
    # pipeline_mode API is available, otherwise double-buffered).
    wbuf = 1 if _HAS_PIPELINE_MODE else 2

    def resident_bytes(tb):
        weights = wbuf * (in_p * hid128 + hid128 * out_p + hid128 + out_p) * w_isz
        x_tiles = 2 * tb * in_p * x_isz            # double-buffered x
        o_tiles = 2 * tb * out_p * x_isz           # double-buffered out
        h_interm = tb * hid128 * 4                 # f32 hidden intermediate
        return weights + x_tiles + o_tiles + h_interm

    tile_b_target = max(int(tile_b), SUB)
    tile_b_eff, n_b = balance_batch(tile_b_target)

    if weight_resident is None:
        resident = resident_bytes(tile_b_eff) <= vmem_budget
        # Shrink the batch tile before giving up on weight residency: weight
        # re-streaming per batch tile is usually the dominant HBM cost.
        while not resident and tile_b_target > 4 * SUB:
            tile_b_target = max(tile_b_target // 2, 4 * SUB)
            tile_b_eff, n_b = balance_batch(tile_b_target)
            resident = resident_bytes(tile_b_eff) <= vmem_budget
    else:
        resident = bool(weight_resident)

    b_p = tile_b_eff * n_b

    # --- Hidden tiling (only when not weight-resident). ---
    if resident:
        hid_p = hid128
        n_k = 1
        tile_h_eff = hid_p
    else:
        th_target = max(LANE, min(_round_up(int(tile_h), LANE), hid128))
        n_k = _cdiv(hid128, th_target)
        tile_h_eff = _round_up(_cdiv(hid128, n_k), LANE)
        # Shrink the hidden tile until the tiled working set fits VMEM.
        while True:
            tiled_bytes = (
                2 * (in_p * tile_h_eff + tile_h_eff * out_p + tile_h_eff) * w_isz
                + wbuf * out_p * w_isz                # b2 (grid-invariant)
                + 2 * tile_b_eff * in_p * x_isz       # x tiles
                + 2 * tile_b_eff * out_p * x_isz      # out tiles
                + tile_b_eff * out_p * 4              # f32 accumulator scratch
                + tile_b_eff * tile_h_eff * 4)        # f32 hidden intermediate
            if tiled_bytes <= vmem_budget or tile_h_eff <= LANE:
                break
            th_target = max(LANE, _round_up(tile_h_eff // 2, LANE))
            n_k = _cdiv(hid128, th_target)
            tile_h_eff = _round_up(_cdiv(hid128, n_k), LANE)
        hid_p = tile_h_eff * n_k

    # --- Zero padding (exact: padded hidden cols -> relu(0)=0 -> zero W2 rows;
    #     padded batch rows / out cols sliced off below). ---
    def pad2(a, rows, cols):
        pr, pc = rows - a.shape[0], cols - a.shape[1]
        return jnp.pad(a, ((0, pr), (0, pc))) if (pr or pc) else a

    xp = pad2(x, b_p, in_p)
    w1p = pad2(w1, in_p, hid_p)
    b1p = pad2(b1, 1, hid_p)
    w2p = pad2(w2, hid_p, out_p)
    b2p = pad2(b2, 1, out_p)

    # --- Cost estimate reflecting real HBM traffic. ---
    flops = 2 * b_p * (in_p * hid_p + hid_p * out_p)
    w_bytes = (w1p.size + b1p.size + w2p.size) * w_isz
    w_streams = 1 if resident else n_b         # re-streamed per batch tile
    bytes_accessed = (xp.size * x_isz
                      + w_streams * w_bytes
                      + b2p.size * w_isz
                      + b_p * out_p * x_isz)

    if resident:
        grid = (n_b,)
        kernel = mlp_kernel_resident
        in_specs = [
            pl.BlockSpec((tile_b_eff, in_p), lambda i: (i, 0)),        # x tile
            _single_buffered_spec((in_p, hid_p), lambda i: (0, 0)),    # W1
            _single_buffered_spec((1, hid_p), lambda i: (0, 0)),       # b1
            _single_buffered_spec((hid_p, out_p), lambda i: (0, 0)),   # W2
            _single_buffered_spec((1, out_p), lambda i: (0, 0)),       # b2
        ]
        out_spec = pl.BlockSpec((tile_b_eff, out_p), lambda i: (i, 0))
        scratch = []
        dim_sem = ("parallel",)
    else:
        grid = (n_b, n_k)
        kernel = mlp_kernel_hidden_tiled
        in_specs = [
            pl.BlockSpec((tile_b_eff, in_p), lambda i, k: (i, 0)),         # x
            pl.BlockSpec((in_p, tile_h_eff), lambda i, k: (0, k)),         # W1 slice
            pl.BlockSpec((1, tile_h_eff), lambda i, k: (0, k)),            # b1 slice
            pl.BlockSpec((tile_h_eff, out_p), lambda i, k: (k, 0)),        # W2 slice
            _single_buffered_spec((1, out_p), lambda i, k: (0, 0)),        # b2
        ]
        out_spec = pl.BlockSpec((tile_b_eff, out_p), lambda i, k: (i, 0))
        scratch = [pltpu.VMEM((tile_b_eff, out_p), jnp.float32)]
        dim_sem = ("parallel", "arbitrary")

    # TODO(synk): for very wide out_dim, add an output-column grid axis and a
    # persistent h scratch so acc/out VMEM scale with tile_n, not out_p.
    out = pl.pallas_call(
        kernel,
        out_shape=jax.ShapeDtypeStruct((b_p, out_p), x.dtype),
        grid_spec=pltpu.PrefetchScalarGridSpec(
            num_scalar_prefetch=0,
            grid=grid,
            in_specs=in_specs,
            out_specs=out_spec,
            scratch_shapes=scratch,
        ),
        compiler_params=pltpu.CompilerParams(
            dimension_semantics=dim_sem,
            vmem_limit_bytes=vmem_budget,
        ),
        cost_estimate=pl.CostEstimate(
            flops=flops, transcendentals=0, bytes_accessed=bytes_accessed),
    )(xp, w1p, b1p, w2p, b2p)

    return out[:B, :out_dim]


# ---------------------------------------------------------------------------
# Init helpers + reference + tests
# ---------------------------------------------------------------------------

def init_linear_params(key, fan_in, fan_out, dtype=jnp.float32):
    """torch.nn.Linear default init: U(-1/sqrt(fan_in), 1/sqrt(fan_in)).
    Weight returned already transposed to [fan_in, fan_out]."""
    kw, kb = jax.random.split(key)
    bound = 1.0 / math.sqrt(fan_in)
    w = jax.random.uniform(kw, (fan_in, fan_out), dtype, -bound, bound)
    b = jax.random.uniform(kb, (1, fan_out), dtype, -bound, bound)
    return w, b


def _reference(x, w1, b1, w2, b2):
    hp = jax.lax.Precision.HIGHEST
    h = jnp.maximum(jnp.dot(x, w1, precision=hp) + b1, 0.0)
    return jnp.dot(h, w2, precision=hp) + b2


if __name__ == "__main__":
    key = jax.random.PRNGKey(0)

    # --- Case 1: the module's own tiny shapes (in_dim=2, hidden=5, out_dim=2).
    in_dim, hidden_dim, out_dim = 2, 5, 2
    batch = 8
    k_x, k_l1, k_l2, key = jax.random.split(key, 4)
    x = jax.random.normal(k_x, (batch, in_dim), jnp.float32)
    w1, b1 = init_linear_params(k_l1, in_dim, hidden_dim)
    w2, b2 = init_linear_params(k_l2, hidden_dim, out_dim)

    out = simple_feed_forward(x, w1, b1, w2, b2)
    jax.block_until_ready(out)
    ref = _reference(x, w1, b1, w2, b2)
    assert out.shape == (batch, out_dim)
    assert jnp.allclose(out, ref, atol=1e-4, rtol=1e-4)

    # --- Case 2: ragged shapes, auto weight-resident path (balanced batch
    # tiling, >=2 "parallel" grid steps, weights loaded once).
    in_dim, hidden_dim, out_dim = 70, 1100, 50
    batch = 300
    k_x, k_l1, k_l2, key = jax.random.split(key, 4)
    x = jax.random.normal(k_x, (batch, in_dim), jnp.float32)
    w1, b1 = init_linear_params(k_l1, in_dim, hidden_dim)
    w2, b2 = init_linear_params(k_l2, hidden_dim, out_dim)

    out = simple_feed_forward(x, w1, b1, w2, b2, tile_b=128)
    jax.block_until_ready(out)
    ref = _reference(x, w1, b1, w2, b2)
    assert out.shape == (batch, out_dim)
    assert jnp.allclose(out, ref, atol=2e-4, rtol=2e-4)

    # --- Case 3: force the hidden-reduction (accumulator) path to keep it
    # exercised and correct (same shapes as case 2).
    out = simple_feed_forward(x, w1, b1, w2, b2, tile_b=128, tile_h=256,
                              weight_resident=False)
    jax.block_until_ready(out)
    assert jnp.allclose(out, ref, atol=2e-4, rtol=2e-4)

    print("KERNEL_OK")
</pallas_src>

<mosaic_0001>
module attributes {stable_mosaic.version = 11 : i64} {
  func.func @mlp_kernel_resident(%arg0: i32, %arg1: memref<8x128xf32, #tpu.memory_space<vmem>>, %arg2: memref<128x128xf32, #tpu.memory_space<vmem>>, %arg3: memref<1x128xf32, #tpu.memory_space<vmem>>, %arg4: memref<128x128xf32, #tpu.memory_space<vmem>>, %arg5: memref<1x128xf32, #tpu.memory_space<vmem>>, %arg6: memref<8x128xf32, #tpu.memory_space<vmem>>) attributes {dimension_semantics = [#tpu.dimension_semantics<parallel>], iteration_bounds = array<i64: 1>, scalar_prefetch = 0 : i64, scratch_operands = 0 : i64, tpu.core_type = #tpu.core_type<tc>, window_params = [{transform_indices = @transform_0, window_bounds = array<i64: 8, 128>}, {pipeline_mode = #tpu.pipeline_mode<synchronous>, transform_indices = @transform_1, window_bounds = array<i64: 128, 128>}, {pipeline_mode = #tpu.pipeline_mode<synchronous>, transform_indices = @transform_2, window_bounds = array<i64: 1, 128>}, {pipeline_mode = #tpu.pipeline_mode<synchronous>, transform_indices = @transform_3, window_bounds = array<i64: 128, 128>}, {pipeline_mode = #tpu.pipeline_mode<synchronous>, transform_indices = @transform_4, window_bounds = array<i64: 1, 128>}, {transform_indices = @transform_5, window_bounds = array<i64: 8, 128>}]} {
    %c0 = arith.constant 0 : index
    %c0_0 = arith.constant 0 : index
    %0 = vector.load %arg1[%c0, %c0_0] : memref<8x128xf32, #tpu.memory_space<vmem>>, vector<8x128xf32>
    %c0_1 = arith.constant 0 : index
    %c0_2 = arith.constant 0 : index
    %1 = vector.load %arg2[%c0_1, %c0_2] : memref<128x128xf32, #tpu.memory_space<vmem>>, vector<128x128xf32>
    %cst = arith.constant dense<0.000000e+00> : vector<8x128xf32>
    %2 = tpu.matmul %0, %1, %cst {dimension_numbers = #tpu.dot_dimension_numbers<[1], [0], [0], [1], [0, 0, 1, 1], [], []>} : vector<8x128xf32>, vector<128x128xf32>, vector<8x128xf32> -> vector<8x128xf32>
    %c0_3 = arith.constant 0 : index
    %c0_4 = arith.constant 0 : index
    %3 = vector.load %arg3[%c0_3, %c0_4] : memref<1x128xf32, #tpu.memory_space<vmem>>, vector<1x128xf32>
    %4 = vector.broadcast %3 : vector<1x128xf32> to vector<8x128xf32>
    %5 = arith.addf %2, %4 : vector<8x128xf32>
    %cst_5 = arith.constant 0.000000e+00 : f32
    %6 = vector.broadcast %cst_5 : f32 to vector<8x128xf32>
    %7 = arith.maximumf %5, %6 : vector<8x128xf32>
    %c0_6 = arith.constant 0 : index
    %c0_7 = arith.constant 0 : index
    %8 = vector.load %arg4[%c0_6, %c0_7] : memref<128x128xf32, #tpu.memory_space<vmem>>, vector<128x128xf32>
    %cst_8 = arith.constant dense<0.000000e+00> : vector<8x128xf32>
    %9 = tpu.matmul %7, %8, %cst_8 {dimension_numbers = #tpu.dot_dimension_numbers<[1], [0], [0], [1], [0, 0, 1, 1], [], []>} : vector<8x128xf32>, vector<128x128xf32>, vector<8x128xf32> -> vector<8x128xf32>
    %c0_9 = arith.constant 0 : index
    %c0_10 = arith.constant 0 : index
    %10 = vector.load %arg5[%c0_9, %c0_10] : memref<1x128xf32, #tpu.memory_space<vmem>>, vector<1x128xf32>
    %11 = vector.broadcast %10 : vector<1x128xf32> to vector<8x128xf32>
    %12 = arith.addf %9, %11 : vector<8x128xf32>
    %c0_11 = arith.constant 0 : index
    %c0_12 = arith.constant 0 : index
    %13 = vector.load %arg6[%c0_11, %c0_12] : memref<8x128xf32, #tpu.memory_space<vmem>>, vector<8x128xf32>
    tpu.vector_store %arg6[%c0_11, %c0_12], %12 {strides = array<i32>} : memref<8x128xf32, #tpu.memory_space<vmem>>, vector<8x128xf32>,
    return
  }
  func.func @transform_0(%arg0: i32) -> (i32, i32) {
    %c0_i32 = arith.constant 0 : i32
    %c0_i32_0 = arith.constant 0 : i32
    return %arg0, %c0_i32 : i32, i32
  }
  func.func @transform_1(%arg0: i32) -> (i32, i32) {
    %c0_i32 = arith.constant 0 : i32
    %c0_i32_0 = arith.constant 0 : i32
    %c0_i32_1 = arith.constant 0 : i32
    return %c0_i32, %c0_i32_0 : i32, i32
  }
  func.func @transform_2(%arg0: i32) -> (i32, i32) {
    %c0_i32 = arith.constant 0 : i32
    %c0_i32_0 = arith.constant 0 : i32
    %c0_i32_1 = arith.constant 0 : i32
    return %c0_i32, %c0_i32_0 : i32, i32
  }
  func.func @transform_3(%arg0: i32) -> (i32, i32) {
    %c0_i32 = arith.constant 0 : i32
    %c0_i32_0 = arith.constant 0 : i32
    %c0_i32_1 = arith.constant 0 : i32
    return %c0_i32, %c0_i32_0 : i32, i32
  }
  func.func @transform_4(%arg0: i32) -> (i32, i32) {
    %c0_i32 = arith.constant 0 : i32
    %c0_i32_0 = arith.constant 0 : i32
    %c0_i32_1 = arith.constant 0 : i32
    return %c0_i32, %c0_i32_0 : i32, i32
  }
  func.func @transform_5(%arg0: i32) -> (i32, i32) {
    %c0_i32 = arith.constant 0 : i32
    %c0_i32_0 = arith.constant 0 : i32
    return %arg0, %c0_i32 : i32, i32
  }
}

</mosaic_0001>

<bundles_post_ra>
// kernel: tpu_custom_call.1
= control target key start
LH: loop header
LB: loop body
LE: loop exit
PB: predicated region body
PF: predicated region fallthrough
CT: control target
= control target key end

     0   :  { %10 = vsyncpa [#allocation3], 0  ;;  %s331_s0 = inlined_call_operand.hbm [shape: f32[8,128], index: 0, kind: input, shape index: {}]   ;;  %s332_s1 = inlined_call_operand.hbm [shape: f32[128,128], index: 1, kind: input, shape index: {}]   ;;  %s333_s2 = inlined_call_operand.vmem [shape: f32[1,128], index: 2, kind: input, shape index: {}]   ;;  %s334_s3 = inlined_call_operand.hbm [shape: f32[128,128], index: 3, kind: input, shape index: {}]   ;;  %s335_s4 = inlined_call_operand.vmem [shape: f32[1,128], index: 4, kind: input, shape index: {}]   ;;  %s336_s5 = inlined_call_operand.hbm [shape: f32[8,128], index: 5, kind: output, shape index: {}]  }
   0x1   :  { %11 = vsyncpa [#allocation6], 0  ;;  %s28_s20 = sshll.u32 %s332_s1, 4  ;;  %s29_s20 = int_to_ptr.hbm [resolvable:$true] %s28_s20 }
   0x2   :  { %12 = vsyncpa [#allocation4], 0  ;;  %s277_s21 = smov [#allocation5]   ;;  %s18_s25 = sshll.u32 %s331_s0, 4  ;;  %s19_s25 = int_to_ptr.hbm [resolvable:$true] %s18_s25 }
   0x3   :  { %s30_s22 = sshll.u32 %s277_s21, 4  ;;  %s278_s26 = smov 128   ;;  %s31_s22 = int_to_ptr.vmem [resolvable:$true] %s30_s22 }
   0x4   :  { %s279_s27 = smov 8   ;;  %s280_s28 = smov [#allocation2]  }
   0x5   :  { %36 = dma.hbm_to_vmem [thread:$0]  %s29_s20, 2048, %s31_s22, [#allocation6], %s278_s26, %s278_s26, %s279_s27  }
   0x6   :  { %s20_s29 = sshll.u32 %s280_s28, 4  ;;  %s43_s7 = sshll.u32 %s334_s3, 4  ;;  %s21_s29 = int_to_ptr.vmem [resolvable:$true] %s20_s29  ;;  %s44_s7 = int_to_ptr.hbm [resolvable:$true] %s43_s7 }
   0x7   :  { %23 = dma.hbm_to_vmem [thread:$0]  %s19_s25, 128, %s21_s29, [#allocation3]  }
   0x8   :  { %s281_s1 = smov [#allocation7]  }
   0x9   :  { %s45_s8 = sshll.u32 %s281_s1, 4  ;;  %s46_s8 = int_to_ptr.vmem [resolvable:$true] %s45_s8 }
   0xa   :  { %51 = dma.hbm_to_vmem [thread:$0]  %s44_s7, 2048, %s46_s8, [#allocation6], %s278_s26, %s278_s26, %s279_s27  }
   0xb   :  { %271 = dma.done.wait [#allocation3], 128  }
   0xc   :  { %272 = vsyncadd [#allocation3], 4294967168 }
   0xd   :  { %273 = dma.done.wait [#allocation6], 4096  }
   0xe   :  { %274 = vsyncadd [#allocation6], 4294963200  ;;  %v82_v0 = vld [vmem:[#allocation5 + $0x78] sm:$0xff]  ;;  %v81_v1 = vld [vmem:[#allocation5 + $0x70] sm:$0xff]  ;;  %s282_s11 = smov [#allocation8]   ;;  %s156_s15 = sshll.u32 %s336_s5, 4  ;;  %s157_s15 = int_to_ptr.hbm [resolvable:$true] %s156_s15 }
   0xf   :  { %87 = vmatpush.msra.mxu0 %v82_v0  ;;  %v80_v2 = vld [vmem:[#allocation5 + $0x68] sm:$0xff]  ;;  %v79_v3 = vld [vmem:[#allocation5 + $0x60] sm:$0xff]  ;;  %v123_v4 = vld [vmem:[#allocation7 + $0x78] sm:$0xff]  ;;  %s154_s12 = sshll.u32 %s282_s11, 4  ;;  %s155_s12 = int_to_ptr.vmem [resolvable:$true] %s154_s12 }
  0x10   :  { %v78_v5 = vld [vmem:[#allocation5 + $0x58] sm:$0xff]  ;;  %128 = vmatpush.msra.mxu1 %v123_v4  ;;  %v122_v6 = vld [vmem:[#allocation7 + $0x70] sm:$0xff]  ;;  %v121_v7 = vld [vmem:[#allocation7 + $0x68] sm:$0xff] }
  0x11   :  { %88 = vmatpush.msra.mxu0 %v81_v1  ;;  %v77_v8 = vld [vmem:[#allocation5 + $0x50] sm:$0xff]  ;;  %v120_v9 = vld [vmem:[#allocation7 + $0x60] sm:$0xff]  ;;  %v76_v10 = vld [vmem:[#allocation5 + $0x48] sm:$0xff] }
  0x12   :  { %129 = vmatpush.msra.mxu1 %v122_v6  ;;  %v119_v11 = vld [vmem:[#allocation7 + $0x58] sm:$0xff]  ;;  %v75_v12 = vld [vmem:[#allocation5 + $0x40] sm:$0xff]  ;;  %v118_v13 = vld [vmem:[#allocation7 + $0x50] sm:$0xff] }
  0x13   :  { %89 = vmatpush.msra.mxu0 %v80_v2  ;;  %v74_v14 = vld [vmem:[#allocation5 + $0x38] sm:$0xff]  ;;  %v117_v15 = vld [vmem:[#allocation7 + $0x48] sm:$0xff]  ;;  %v73_v16 = vld [vmem:[#allocation5 + $0x30] sm:$0xff] }
  0x14   :  { %130 = vmatpush.msra.mxu1 %v121_v7  ;;  %v116_v17 = vld [vmem:[#allocation7 + $0x40] sm:$0xff]  ;;  %v72_v18 = vld [vmem:[#allocation5 + $0x28] sm:$0xff]  ;;  %v115_v19 = vld [vmem:[#allocation7 + $0x38] sm:$0xff] }
  0x15   :  { %90 = vmatpush.msra.mxu0 %v79_v3  ;;  %v71_v20 = vld [vmem:[#allocation5 + $0x20] sm:$0xff]  ;;  %v114_v21 = vld [vmem:[#allocation7 + $0x30] sm:$0xff]  ;;  %v70_v22 = vld [vmem:[#allocation5 + $0x18] sm:$0xff] }
  0x16   :  { %131 = vmatpush.msra.mxu1 %v120_v9  ;;  %v113_v23 = vld [vmem:[#allocation7 + $0x28] sm:$0xff]  ;;  %v69_v24 = vld [vmem:[#allocation5 + $0x10] sm:$0xff]  ;;  %v112_v25 = vld [vmem:[#allocation7 + $0x20] sm:$0xff] }
  0x17   :  { %91 = vmatpush.msra.mxu0 %v78_v5  ;;  %v68_v26 = vld [vmem:[#allocation5 + $0x8] sm:$0xff]  ;;  %v111_v27 = vld [vmem:[#allocation7 + $0x18] sm:$0xff]  ;;  %v67_v28 = vld [vmem:[#allocation5] sm:$0xff] }
  0x18   :  { %132 = vmatpush.msra.mxu1 %v119_v11  ;;  %v66_v29 = vld [vmem:[#allocation2] sm:$0xff]  ;;  %v110_v30 = vld [vmem:[#allocation7 + $0x10] sm:$0xff]  ;;  %v109_v31 = vld [vmem:[#allocation7 + $0x8] sm:$0xff] }
  0x19   :  { %92 = vmatpush.msra.mxu0 %v77_v8  ;;  %v108_v32 = vld [vmem:[#allocation7] sm:$0xff]  ;;  %v173_v33 = vld [vmem:[%s333_s2] ss:$0 sm:$0xff] }
  0x1a   :  { %133 = vmatpush.msra.mxu1 %v118_v13  ;;  %v174_v37 = vld [vmem:[%s335_s4] ss:$0 sm:$0xff] }
  0x1b   :  { %93 = vmatpush.msra.mxu0 %v76_v10 }
  0x1c   :  { %134 = vmatpush.msra.mxu1 %v117_v15 }
  0x1d   :  { %94 = vmatpush.msra.mxu0 %v75_v12 }
  0x1e   :  { %135 = vmatpush.msra.mxu1 %v116_v17 }
  0x1f   :  { %95 = vmatpush.msra.mxu0 %v74_v14 }
  0x20   :  { %136 = vmatpush.msra.mxu1 %v115_v19 }
  0x21   :  { %96 = vmatpush.msra.mxu0 %v73_v16 }
  0x22   :  { %137 = vmatpush.msra.mxu1 %v114_v21 }
  0x23   :  { %97 = vmatpush.msra.mxu0 %v72_v18 }
  0x24   :  { %138 = vmatpush.msra.mxu1 %v113_v23 }
  0x25   :  { %98 = vmatpush.msra.mxu0 %v71_v20 }
  0x26   :  { %139 = vmatpush.msra.mxu1 %v112_v25 }
  0x27   :  { %99 = vmatpush.msra.mxu0 %v70_v22 }
  0x28   :  { %140 = vmatpush.msra.mxu1 %v111_v27 }
  0x29   :  { %100 = vmatpush.msra.mxu0 %v69_v24 }
  0x2a   :  { %141 = vmatpush.msra.mxu1 %v110_v30 }
  0x2b   :  { %101 = vmatpush.msra.mxu0 %v68_v26 }
  0x2c   :  { %142 = vmatpush.msra.mxu1 %v109_v31 }
  0x2d   :  { %102 = vmatpush.msra.mxu0 %v67_v28 }
  0x2e   :  { %103 = vmatmul.f32.vlgmr.msra.gmra.mxu0 %v66_v29  ;;  %143 = vmatpush.msra.mxu1 %v108_v32 }
  0xab   :  { %v104_v34 = vpop.f32.mrf.mxu0 }
  0xac   :  { %v105_v35 = vadd.f32 %v173_v33, %v104_v34 }
  0xae   :  { %v107_v36 = vmax.f32 %v105_v35, 0.0 }
  0xb0   :  { %144 = vmatmul.f32.vlgmr.msra.gmra.mxu1 %v107_v36 }
 0x12d   :  { %v145_v38 = vpop.f32.mrf.mxu1 }
 0x12e   :  { %v146_v39 = vadd.f32 %v174_v37, %v145_v38 }
 0x130   :  { %148 = vst [vmem:[#allocation8] sm:$0xff] %v146_v39 }
 0x131   :  { %159 = dma.vmem_to_hbm [thread:$0]  %s155_s12, 128, %s157_s15, [#allocation4]  }
 0x132   :  { %275 = dma.done.wait [#allocation4], 128  }
 0x133   :  { %276 = vsyncadd [#allocation4], 4294967168 }
 0x134   :  { %164 = vsyncpa [#allocation3], 1 }
 0x135   :  { %165 = vsyncpa [#allocation6], 1 }
 0x136   :  { %166 = vsyncpa [#allocation4], 1 }

</bundles_post_ra>
